<compile_context>
chip_gen: v6e
topology: v6e:2x2x1
jax: 0.10.0
libtpu: 0.0.40
codegen_flags: <defaults>
</compile_context>

<pallas_src>
import jax
import jax.numpy as jnp
from jax.experimental import pallas as pl
from jax.experimental.pallas import tpu as pltpu

LANE = 128


# ----------------------------- Pallas kernel --------------------------------
def gcn_forward_kernel(ei_ref, x_ref, w_ref, b_ref, o_ref):
    n, d0 = x_ref.shape
    e = ei_ref.shape[1]

    src = ei_ref[0:1, :]                                   # (1, E) int32
    dst = ei_ref[1:2, :]                                   # (1, E) int32
    node_ids = jax.lax.broadcasted_iota(jnp.int32, (n, e), 0)

    # Destination one-hot, built directly in bf16 (0/1 values are exact).
    oh_dst = (node_ids == dst).astype(jnp.bfloat16)        # (N, E)

    # deg[i] = in-degree(i) + 1 (self loop) == rowsum(A + I), matching gcn_norm.
    # NOTE: counts accumulate in f32 (bf16 would round above 256 duplicates).
    deg = jnp.sum(oh_dst, axis=1, keepdims=True, dtype=jnp.float32) + 1.0
    dinv = jax.lax.rsqrt(deg)                              # (N, 1) f32

    # Source one-hot with the COLUMN normalization dinv[src] folded in.
    oh_src = jnp.where(node_ids == src, dinv, 0.0).astype(jnp.bfloat16)  # (N, E)

    # a_scaled[i, j] = (#edges j->i) * dinv[j]   (contract E of both operands).
    a_scaled = jax.lax.dot_general(
        oh_dst, oh_src, (((1,), (1,)), ((), ())),
        preferred_element_type=jnp.float32)                # (N, N) f32

    eye = (jax.lax.broadcasted_iota(jnp.int32, (n, n), 0)
           == jax.lax.broadcasted_iota(jnp.int32, (n, n), 1)).astype(jnp.float32)
    # A_hat[i, j] = dinv[i] * (A + I)[i, j] * dinv[j], normalized exactly once.
    a_bf = (dinv * a_scaled + (dinv * dinv) * eye).astype(jnp.bfloat16)

    # --- Layer 1 (reassociated, D0 < D1): H1 = ReLU((A_hat @ X) @ W1 + b1) ---
    ax = jnp.dot(a_bf, x_ref[...], preferred_element_type=jnp.float32)   # (N, D0)
    h1 = jnp.dot(ax.astype(jnp.bfloat16), w_ref[:d0, :],
                 preferred_element_type=jnp.float32) + b_ref[0:1, :]     # (N, Dp)
    h1 = jnp.maximum(h1, 0.0)                                            # ReLU, f32

    # --- Layer 2: OUT = A_hat @ (H1 @ W2) + b2 ---
    hw = jnp.dot(h1.astype(jnp.bfloat16), w_ref[d0:, :],
                 preferred_element_type=jnp.float32)                     # (N, Dp)
    o_ref[...] = jnp.dot(a_bf, hw.astype(jnp.bfloat16),
                         preferred_element_type=jnp.float32) + b_ref[1:2, :]


# ---------------------- one-time parameter preparation -----------------------
def prepare_gcn_params(x, w1, b1, w2, b2):
    """Pad / stack / cast parameters once at init (hoisted out of the fwd path).

    Returns (x_bf16, w_stack_bf16, b_stack_f32, d2) where
      w_stack = [W1 (d0 x Dp) ; W2 (Dp x Dp)]  zero-padded to lane width,
      b_stack = [b1 ; b2]                      zero-padded, f32.
    Zero padding is exact; the wrapper slices the logical d2 columns back out.
    """
    d0 = x.shape[1]
    d1, d2 = w1.shape[1], w2.shape[1]
    dp = ((max(d1, d2) + LANE - 1) // LANE) * LANE
    w1p = jnp.zeros((d0, dp), jnp.float32).at[:, :d1].set(w1)
    w2p = jnp.zeros((dp, dp), jnp.float32).at[:d1, :d2].set(w2)
    w_stack = jnp.concatenate([w1p, w2p], axis=0).astype(jnp.bfloat16)  # (d0+dp, dp)
    b_stack = (jnp.zeros((2, dp), jnp.float32)
               .at[0, :d1].set(b1.reshape(-1))
               .at[1, :d2].set(b2.reshape(-1)))
    x_bf = x.astype(jnp.bfloat16)                                       # MXU operand
    return x_bf, w_stack, b_stack, d2


# ------------------------------ forward wrapper ------------------------------
def gcn_forward(edge_index, x_bf, w_stack, b_stack, d2):
    n, d0 = x_bf.shape
    e = edge_index.shape[1]
    dp = w_stack.shape[1]
    ei = edge_index.astype(jnp.int32)

    flops = int(2 * (n * n * e + n * n * d0 + n * d0 * dp
                     + n * dp * dp + n * n * dp))
    bytes_accessed = int(ei.size * 4 + x_bf.size * 2 + w_stack.size * 2
                         + b_stack.size * 4 + n * dp * 4)
    cost = pl.CostEstimate(flops=flops, transcendentals=int(n),
                           bytes_accessed=bytes_accessed)

    vmem = pl.BlockSpec(memory_space=pltpu.MemorySpace.VMEM)
    out = pl.pallas_call(
        gcn_forward_kernel,
        out_shape=jax.ShapeDtypeStruct((n, dp), jnp.float32),
        in_specs=[vmem] * 4,
        out_specs=vmem,
        cost_estimate=cost,
    )(ei, x_bf, w_stack, b_stack)
    return out[:, :d2]


# ------------------------------ reference ------------------------------------
def gcn_reference(edge_index, x, w1, b1, w2, b2):
    """Pure-JAX f32 reference (dense A_hat path)."""
    n = x.shape[0]
    src, dst = edge_index[0], edge_index[1]
    a = jnp.zeros((n, n), jnp.float32).at[dst, src].add(1.0)
    a = a + jnp.eye(n, dtype=jnp.float32)
    deg = a.sum(axis=1)
    dinv = 1.0 / jnp.sqrt(deg)
    a_hat = dinv[:, None] * a * dinv[None, :]
    h1 = jnp.maximum(a_hat @ (x @ w1) + b1, 0.0)
    return a_hat @ (h1 @ w2) + b2


def glorot(key, shape):
    limit = jnp.sqrt(6.0 / (shape[0] + shape[1]))
    return jax.random.uniform(key, shape, jnp.float32, -limit, limit)


# -------------------------------- main ---------------------------------------
if __name__ == "__main__":
    # GCN(num_nodes=64, embed_dims=[32, 64, 16]): 2 GCNConv layers, ReLU between.
    num_nodes = 64
    embed_dims = [32, 64, 16]
    num_edges = 128

    key = jax.random.PRNGKey(0)
    k_emb, k_w1, k_w2, k_src, k_dst = jax.random.split(key, 5)

    # Parameters (mirroring torch defaults: Embedding ~ N(0,1), GCNConv weight
    # glorot, bias zeros).
    emb_weight = jax.random.normal(k_emb, (num_nodes, embed_dims[0]), jnp.float32)
    w1 = glorot(k_w1, (embed_dims[0], embed_dims[1]))
    b1 = jnp.zeros((1, embed_dims[1]), jnp.float32)
    w2 = glorot(k_w2, (embed_dims[1], embed_dims[2]))
    b2 = jnp.zeros((1, embed_dims[2]), jnp.float32)

    # One-time parameter prep (padding / stacking / bf16 casts hoisted here).
    x_bf, w_stack, b_stack, d2 = prepare_gcn_params(emb_weight, w1, b1, w2, b2)
    x_bf, w_stack, b_stack = jax.block_until_ready((x_bf, w_stack, b_stack))

    # Runtime input of GCN.forward: edge_index of shape (2, E).
    src = jax.random.randint(k_src, (num_edges,), 0, num_nodes, jnp.int32)
    dst = jax.random.randint(k_dst, (num_edges,), 0, num_nodes, jnp.int32)
    edge_index = jnp.stack([src, dst], axis=0)

    out = gcn_forward(edge_index, x_bf, w_stack, b_stack, d2)
    out = jax.block_until_ready(out)

    assert out.shape == (num_nodes, embed_dims[-1])
    assert bool(jnp.all(jnp.isfinite(out)))
    ref = gcn_reference(edge_index, emb_weight, w1, b1, w2, b2)
    assert bool(jnp.allclose(out, ref, rtol=1e-1, atol=1e-1)), \
        float(jnp.max(jnp.abs(out - ref)))
    print("KERNEL_OK")
</pallas_src>

<mosaic_0001>
module attributes {stable_mosaic.version = 11 : i64} {
  func.func @gcn_forward_kernel(%arg0: memref<2x128xi32, #tpu.memory_space<vmem>>, %arg1: memref<64x32xbf16, #tpu.memory_space<vmem>>, %arg2: memref<160x128xbf16, #tpu.memory_space<vmem>>, %arg3: memref<2x128xf32, #tpu.memory_space<vmem>>, %arg4: memref<64x128xf32, #tpu.memory_space<vmem>>) attributes {dimension_semantics = [], scalar_prefetch = 0 : i64, scratch_operands = 0 : i64, tpu.core_type = #tpu.core_type<tc>} {
    %c0 = arith.constant 0 : index
    %c0_0 = arith.constant 0 : index
    %0 = vector.load %arg0[%c0, %c0_0] : memref<2x128xi32, #tpu.memory_space<vmem>>, vector<1x128xi32>
    %c1 = arith.constant 1 : index
    %c0_1 = arith.constant 0 : index
    %1 = vector.load %arg0[%c1, %c0_1] : memref<2x128xi32, #tpu.memory_space<vmem>>, vector<1x128xi32>
    %2 = tpu.iota {dimensions = array<i32: 0>} : vector<64x128xi32>
    %3 = vector.broadcast %1 : vector<1x128xi32> to vector<64x128xi32>
    %4 = arith.cmpi eq, %2, %3 : vector<64x128xi32>
    %5 = arith.extui %4 : vector<64x128xi1> to vector<64x128xi32>
    %6 = arith.sitofp %5 : vector<64x128xi32> to vector<64x128xf32>
    %7 = arith.truncf %6 : vector<64x128xf32> to vector<64x128xbf16>
    %8 = arith.extf %7 : vector<64x128xbf16> to vector<64x128xf32>
    %cst = arith.constant dense<0.000000e+00> : vector<64xf32>
    %9 = vector.multi_reduction <add>, %8, %cst [1] : vector<64x128xf32> to vector<64xf32>
    %10 = vector.shape_cast %9 : vector<64xf32> to vector<64x1xf32>
    %cst_2 = arith.constant 1.000000e+00 : f32
    %11 = vector.broadcast %cst_2 : f32 to vector<64x1xf32>
    %12 = arith.addf %10, %11 : vector<64x1xf32>
    %13 = math.rsqrt %12 : vector<64x1xf32>
    %14 = vector.broadcast %0 : vector<1x128xi32> to vector<64x128xi32>
    %15 = arith.cmpi eq, %2, %14 : vector<64x128xi32>
    %cst_3 = arith.constant 0.000000e+00 : f32
    %16 = vector.shape_cast %13 : vector<64x1xf32> to vector<64x1xf32>
    %17 = vector.broadcast %16 : vector<64x1xf32> to vector<64x128xf32>
    %18 = vector.broadcast %cst_3 : f32 to vector<64x128xf32>
    %19 = arith.select %15, %17, %18 : vector<64x128xi1>, vector<64x128xf32>
    %20 = arith.truncf %19 : vector<64x128xf32> to vector<64x128xbf16>
    %cst_4 = arith.constant dense<0.000000e+00> : vector<64x64xf32>
    %21 = tpu.matmul %7, %20, %cst_4 {dimension_numbers = #tpu.dot_dimension_numbers<[1], [1], [0], [0], [0, 0, 1, 0], [], []>} : vector<64x128xbf16>, vector<64x128xbf16>, vector<64x64xf32> -> vector<64x64xf32>
    %22 = tpu.iota {dimensions = array<i32: 0>} : vector<64x64xi32>
    %23 = tpu.iota {dimensions = array<i32: 1>} : vector<64x64xi32>
    %24 = arith.cmpi eq, %22, %23 : vector<64x64xi32>
    %25 = arith.extui %24 : vector<64x64xi1> to vector<64x64xi32>
    %26 = arith.sitofp %25 : vector<64x64xi32> to vector<64x64xf32>
    %27 = vector.broadcast %13 : vector<64x1xf32> to vector<64x64xf32>
    %28 = arith.mulf %27, %21 : vector<64x64xf32>
    %29 = arith.mulf %13, %13 : vector<64x1xf32>
    %30 = vector.broadcast %29 : vector<64x1xf32> to vector<64x64xf32>
    %31 = arith.mulf %30, %26 : vector<64x64xf32>
    %32 = arith.addf %28, %31 : vector<64x64xf32>
    %33 = arith.truncf %32 : vector<64x64xf32> to vector<64x64xbf16>
    %c0_5 = arith.constant 0 : index
    %c0_6 = arith.constant 0 : index
    %34 = vector.load %arg1[%c0_5, %c0_6] : memref<64x32xbf16, #tpu.memory_space<vmem>>, vector<64x32xbf16>
    %cst_7 = arith.constant dense<0.000000e+00> : vector<64x32xf32>
    %35 = tpu.matmul %33, %34, %cst_7 {dimension_numbers = #tpu.dot_dimension_numbers<[1], [0], [0], [1], [0, 0, 1, 1], [], []>} : vector<64x64xbf16>, vector<64x32xbf16>, vector<64x32xf32> -> vector<64x32xf32>
    %36 = arith.truncf %35 : vector<64x32xf32> to vector<64x32xbf16>
    %c0_8 = arith.constant 0 : index
    %c0_9 = arith.constant 0 : index
    %37 = vector.load %arg2[%c0_8, %c0_9] : memref<160x128xbf16, #tpu.memory_space<vmem>>, vector<32x128xbf16>
    %cst_10 = arith.constant dense<0.000000e+00> : vector<64x128xf32>
    %38 = tpu.matmul %36, %37, %cst_10 {dimension_numbers = #tpu.dot_dimension_numbers<[1], [0], [0], [1], [0, 0, 1, 1], [], []>} : vector<64x32xbf16>, vector<32x128xbf16>, vector<64x128xf32> -> vector<64x128xf32>
    %c0_11 = arith.constant 0 : index
    %c0_12 = arith.constant 0 : index
    %39 = vector.load %arg3[%c0_11, %c0_12] : memref<2x128xf32, #tpu.memory_space<vmem>>, vector<1x128xf32>
    %40 = vector.broadcast %39 : vector<1x128xf32> to vector<64x128xf32>
    %41 = arith.addf %38, %40 : vector<64x128xf32>
    %cst_13 = arith.constant 0.000000e+00 : f32
    %42 = vector.broadcast %cst_13 : f32 to vector<64x128xf32>
    %43 = arith.maximumf %41, %42 : vector<64x128xf32>
    %44 = arith.truncf %43 : vector<64x128xf32> to vector<64x128xbf16>
    %c32 = arith.constant 32 : index
    %c0_14 = arith.constant 0 : index
    %45 = vector.load %arg2[%c32, %c0_14] : memref<160x128xbf16, #tpu.memory_space<vmem>>, vector<128x128xbf16>
    %cst_15 = arith.constant dense<0.000000e+00> : vector<64x128xf32>
    %46 = tpu.matmul %44, %45, %cst_15 {dimension_numbers = #tpu.dot_dimension_numbers<[1], [0], [0], [1], [0, 0, 1, 1], [], []>} : vector<64x128xbf16>, vector<128x128xbf16>, vector<64x128xf32> -> vector<64x128xf32>
    %47 = arith.truncf %46 : vector<64x128xf32> to vector<64x128xbf16>
    %cst_16 = arith.constant dense<0.000000e+00> : vector<64x128xf32>
    %48 = tpu.matmul %33, %47, %cst_16 {dimension_numbers = #tpu.dot_dimension_numbers<[1], [0], [0], [1], [0, 0, 1, 1], [], []>} : vector<64x64xbf16>, vector<64x128xbf16>, vector<64x128xf32> -> vector<64x128xf32>
    %c1_17 = arith.constant 1 : index
    %c0_18 = arith.constant 0 : index
    %49 = vector.load %arg3[%c1_17, %c0_18] : memref<2x128xf32, #tpu.memory_space<vmem>>, vector<1x128xf32>
    %50 = vector.broadcast %49 : vector<1x128xf32> to vector<64x128xf32>
    %51 = arith.addf %48, %50 : vector<64x128xf32>
    %c0_19 = arith.constant 0 : index
    %c0_20 = arith.constant 0 : index
    %52 = vector.load %arg4[%c0_19, %c0_20] : memref<64x128xf32, #tpu.memory_space<vmem>>, vector<64x128xf32>
    tpu.vector_store %arg4[%c0_19, %c0_20], %51 {strides = array<i32>} : memref<64x128xf32, #tpu.memory_space<vmem>>, vector<64x128xf32>,
    return
  }
}

</mosaic_0001>

<bundles_post_ra>
// kernel: tpu_custom_call.1
= control target key start
LH: loop header
LB: loop body
LE: loop exit
PB: predicated region body
PF: predicated region fallthrough
CT: control target
= control target key end

     0   :  { %9 = vsyncpa [#allocation3], 0  ;;  %s1193_s0 = inlined_call_operand.vmem [shape: s32[2,128], index: 0, kind: input, shape index: {}]   ;;  %s1194_s1 = inlined_call_operand.vmem [shape: bf16[64,32], index: 1, kind: input, shape index: {}]   ;;  %s1195_s2 = inlined_call_operand.hbm [shape: bf16[160,128], index: 2, kind: input, shape index: {}]   ;;  %s1196_s3 = inlined_call_operand.vmem [shape: f32[2,128], index: 3, kind: input, shape index: {}]   ;;  %s1197_s4 = inlined_call_operand.hbm [shape: f32[64,128], index: 4, kind: output, shape index: {}]  }
   0x1   :  { %10 = vsyncpa [#allocation4], 0  ;;  %s994_s15 = smov [#allocation2]  }
   0x2   :  { %s20_s16 = sshll.u32 %s994_s15, 4  ;;  %s21_s16 = int_to_ptr.vmem [resolvable:$true] %s20_s16 }
   0x3   :  { %s958_s17 = scalar_lea.vmem %s21_s16, 1280  ;;  %p963_p1 = scmp.lt.s32.totalorder %s21_s16, %s21_s16 }
   0x4   :  { %p959_p0 = scmp.ne.s32.totalorder %s21_s16, %s958_s17  ;;  %p964_p2 = scmp.lt.s32.totalorder %s958_s17, %s958_s17 }
   0x6   :  { %p965_p3 = por %p964_p2, %p963_p1 }
   0x8   :  { %p966_p4 = pnand %p965_p3, %p959_p0 }
   0xa   :  { %969 = shalt.err (!%p966_p4)
}
   0xb   :  { %s995_s18 = smov 64   ;;  %s996_s19 = smov 4  }
   0xc   :  { %26 = dma.hbm_to_vmem [thread:$0]  %s1195_s2, 1280, %s21_s16, [#allocation3], %s995_s18, %s995_s18, %s996_s19  }
   0xd   :  { %990 = dma.done.wait [#allocation3], 1280  }
   0xe   :  { %991 = vsyncadd [#allocation3], 4294966016  ;;  %v35_v0 = vlaneseq  ;;  %v720_v8 = vld [vmem:[%s1193_s0 + $0x1] ss:$0 sm:$0xff]  ;;  %v997_v9 = vmov 0.0   ;;  %v920_v37 = vld [vmem:[%s1194_s1 + $0x18] sm:$0xff]  }
   0xf   :  { %v729_v22 = vld [vmem:[%s1193_s0] ss:$0 sm:$0xff]  ;;  %v998_v36 = vmov 1.0|1.0   ;;  %844 = vmatprep.subr.bf16.mxu1 %v920_v37  ;;  %s999_s9 = smov [#allocation5]  }
  0x10   :  { %v1030_v1 = vshrl.u32 %v35_v0, 7  ;;  %v206_v24 = vand.u32 127, %v35_v0  ;;  %845 = vmatpush3.bf16.msra.mxu1 %v920_v37  ;;  %s708_s10 = sshll.u32 %s999_s9, 4  ;;  %s709_s10 = int_to_ptr.vmem [resolvable:$true] %s708_s10 }
  0x11   :  { %p975_p6 = scmp.lt.s32.totalorder %s709_s10, %s709_s10 }
  0x12   :  { %v42_v2 = vadd.s32 48, %v1030_v1  ;;  %v43_v3 = vadd.s32 56, %v1030_v1  ;;  %v40_v4 = vadd.s32 32, %v1030_v1  ;;  %v41_v5 = vadd.s32 40, %v1030_v1 }
  0x13   :  { %v39_v6 = vadd.s32 24, %v1030_v1  ;;  %v38_v7 = vadd.s32 16, %v1030_v1  ;;  %v37_v17 = vadd.s32 8, %v1030_v1  ;;  %vm48_vm10 = vcmp.eq.s32.totalorder %v1030_v1, %v720_v8 }
  0x14   :  { %vm54_vm0 = vcmp.eq.s32.totalorder %v42_v2, %v720_v8  ;;  %vm55_vm1 = vcmp.eq.s32.totalorder %v43_v3, %v720_v8  ;;  %vm52_vm2 = vcmp.eq.s32.totalorder %v40_v4, %v720_v8  ;;  %vm53_vm3 = vcmp.eq.s32.totalorder %v41_v5, %v720_v8 }
  0x15   :  { %v727_v10 = vsel %vm54_vm0, 1.0, %v997_v9  ;;  %vm1041_vm4 = vmpackc.low %vm55_vm1, %vm54_vm0  ;;  %v725_v12 = vsel %vm52_vm2, 1.0, %v997_v9  ;;  %vm51_vm6 = vcmp.eq.s32.totalorder %v39_v6, %v720_v8  ;;  %vm50_vm7 = vcmp.eq.s32.totalorder %v38_v7, %v720_v8 }
  0x16   :  { %96 = vadd.xlane.f32.xlu0 %v727_v10  ;;  %92 = vadd.xlane.f32.xlu1 %v725_v12  ;;  %vm1045_vm5 = vmpackc.low %vm53_vm3, %vm52_vm2  ;;  %v728_v14 = vsel %vm55_vm1, 1.0, %v997_v9  ;;  %v726_v15 = vsel %vm53_vm3, 1.0, %v997_v9  ;;  %v724_v18 = vsel %vm51_vm6, 1.0, %v997_v9  ;;  %v723_v19 = vsel %vm50_vm7, 1.0, %v997_v9 }
  0x17   :  { %vm1049_vm8 = vmpackc.low %vm51_vm6, %vm50_vm7  ;;  %vm1198_vm9 = vcmp.eq.s32.totalorder %v37_v17, %v720_v8  ;;  %v721_v21 = vsel %vm48_vm10, 1.0, %v997_v9  ;;  %vm126_vm11 = vcmp.eq.s32.totalorder %v42_v2, %v729_v22  ;;  %vm127_vm12 = vcmp.eq.s32.totalorder %v43_v3, %v729_v22 }
  0x18   :  { %v722_v20 = vsel %vm1198_vm9, 1.0, %v997_v9  ;;  %vm1061_vm13 = vmpackc.low %vm127_vm12, %vm126_vm11  ;;  %vm213_vm14 = vcmp.eq.s32.totalorder %v42_v2, %v206_v24  ;;  %vm214_vm15 = vcmp.eq.s32.totalorder %v43_v3, %v206_v24  ;;  %vm124_vm0 = vcmp.eq.s32.totalorder %v40_v4, %v729_v22  ;;  %v921_v2 = vld [vmem:[%s1194_s1 + $0x10] sm:$0xff]   ;;  %v922_v3 = vld [vmem:[%s1194_s1 + $0x8] sm:$0xff]  }
  0x19   :  { %v1065_v25 = vsel %vm213_vm14, 1.0, %v997_v9  ;;  %v1067_v26 = vsel %vm214_vm15, 1.0, %v997_v9  ;;  %vm125_vm1 = vcmp.eq.s32.totalorder %v41_v5, %v729_v22  ;;  %vm211_vm3 = vcmp.eq.s32.totalorder %v40_v4, %v206_v24  ;;  %846 = vmatprep.subr.bf16.mxu1 %v921_v2  ;;  %v923_v4 = vld [vmem:[%s1194_s1] sm:$0xff]  }
  0x1a   :  { %98 = vadd.xlane.f32.xlu0 %v728_v14  ;;  %94 = vadd.xlane.f32.xlu1 %v726_v15  ;;  %vm1069_vm2 = vmpackc.low %vm125_vm1, %vm124_vm0  ;;  %v1073_v28 = vsel %vm211_vm3, 1.0, %v997_v9  ;;  %vm212_vm6 = vcmp.eq.s32.totalorder %v41_v5, %v206_v24  ;;  %vm122_vm7 = vcmp.eq.s32.totalorder %v38_v7, %v729_v22  ;;  %vm123_vm11 = vcmp.eq.s32.totalorder %v39_v6, %v729_v22  ;;  %v924_v5 = vld [vmem:[#allocation2 + $0x8] sm:$0xff]  }
  0x1b   :  { %v1075_v29 = vsel %vm212_vm6, 1.0, %v997_v9  ;;  %vm1077_vm12 = vmpackc.low %vm123_vm11, %vm122_vm7  ;;  %vm209_vm14 = vcmp.eq.s32.totalorder %v38_v7, %v206_v24  ;;  %vm210_vm15 = vcmp.eq.s32.totalorder %v39_v6, %v206_v24  ;;  %vm120_vm0 = vcmp.eq.s32.totalorder %v1030_v1, %v729_v22  ;;  %847 = vmatpush3.bf16.msra.mxu1 %v921_v2 }
  0x1c   :  { %v1081_v31 = vsel %vm209_vm14, 1.0, %v997_v9  ;;  %v1083_v32 = vsel %vm210_vm15, 1.0, %v997_v9  ;;  %vm121_vm1 = vcmp.eq.s32.totalorder %v37_v17, %v729_v22  ;;  %vm207_vm6 = vcmp.eq.s32.totalorder %v1030_v1, %v206_v24  ;;  %848 = vmatprep.subr.bf16.mxu1 %v922_v3 }
  0x1d   :  { %vm1086_vm3 = vmpackc.low %vm121_vm1, %vm120_vm0  ;;  %vm208_vm9 = vcmp.eq.s32.totalorder %v37_v17, %v206_v24  ;;  %v1091_v34 = vsel %vm207_vm6, 1.0, %v997_v9  ;;  %vm1213_vm7 = vcmp.eq.s32.totalorder %v37_v17, %v720_v8 }
  0x1e   :  { %90 = vadd.xlane.f32.xlu1 %v724_v18  ;;  %88 = vadd.xlane.f32.xlu0 %v723_v19  ;;  %v1093_v35 = vsel %vm208_vm9, 1.0, %v997_v9  ;;  %vm742_vm11 = vmpackc.low %vm1213_vm7, %vm48_vm10 }
  0x1f   :  { %836 = vmatprep.mubr.msk.bf16.mxu0 %vm742_vm11, %v998_v36  ;;  %849 = vmatpush3.bf16.msra.mxu1 %v922_v3 }
  0x20   :  { %850 = vmatprep.subr.bf16.mxu1 %v923_v4 }
  0x22   :  { %86 = vadd.xlane.f32.xlu1 %v722_v20  ;;  %84 = vadd.xlane.f32.xlu0 %v721_v21 }
  0x23   :  { %851 = vmatpush3.bf16.msra.mxu1 %v923_v4  ;;  %v931_v4 = vld [vmem:[#allocation2 + $0x20] sm:$0xff]  }
  0x24   :  { %860 = vmatprep.subr.bf16.mxu1 %v924_v5 }
  0x9f   :  { %v97_v38 = vpop.xlane.xlu0 %96  ;;  %v93_v39 = vpop.xlane.xlu1 %92 }
  0xa0   :  { %v106_v40 = vadd.f32 1.0, %v97_v38  ;;  %v104_v41 = vadd.f32 1.0, %v93_v39 }
  0xa2   :  { %934 = vrsqrt.f32 %v106_v40 }
  0xa3   :  { %v99_v42 = vpop.xlane.xlu0 %98  ;;  %v95_v43 = vpop.xlane.xlu1 %94  ;;  %936 = vrsqrt.f32 %v104_v41 }
  0xa4   :  { %v107_v44 = vadd.f32 1.0, %v99_v42  ;;  %v105_v45 = vadd.f32 1.0, %v95_v43 }
  0xa6   :  { %938 = vrsqrt.f32 %v107_v44 }
  0xa7   :  { %940 = vrsqrt.f32 %v105_v45  ;;  %v91_v46 = vpop.xlane.xlu1 %90  ;;  %v89_v47 = vpop.xlane.xlu0 %88 }
  0xa8   :  { %v103_v48 = vadd.f32 1.0, %v91_v46  ;;  %v102_v49 = vadd.f32 1.0, %v89_v47 }
  0xaa   :  { %942 = vrsqrt.f32 %v103_v48 }
  0xab   :  { %944 = vrsqrt.f32 %v102_v49  ;;  %v87_v50 = vpop.xlane.xlu1 %86  ;;  %v85_v51 = vpop.xlane.xlu0 %84 }
  0xac   :  { %v101_v52 = vadd.f32 1.0, %v87_v50  ;;  %v100_v53 = vadd.f32 1.0, %v85_v51 }
  0xae   :  { %946 = vrsqrt.f32 %v101_v52  ;;  %v926_v52 = vld [vmem:[#allocation2 + $0x48] sm:$0xff]  }
  0xaf   :  { %v1101_v54 = vpop.eup %934  ;;  %948 = vrsqrt.f32 %v100_v53  ;;  %v927_v53 = vld [vmem:[#allocation2 + $0x40] sm:$0xff]  }
  0xb0   :  { %v1103_v55 = vpop.eup %936  ;;  %v245_v27 = vmul.f32 %v1101_v54, %v1101_v54 }
  0xb2   :  { %v253_v40 = vmul.f32 %v1065_v25, %v245_v27 }
  0xb3   :  { %v1105_v56 = vpop.eup %938 }
  0xb4   :  { %v1107_v57 = vpop.eup %940  ;;  %v731_v58 = vpack.c.bf16 %v1105_v56, %v1101_v54 }
  0xb5   :  { %v734_v59 = vpack.c.bf16 %v1107_v57, %v1103_v55  ;;  %v244_v38 = vmul.f32 %v1107_v57, %v1107_v57 }
  0xb6   :  { %828 = vmatprep.subr.msk.bf16.mxu0 %vm1061_vm13, %v731_v58 }
  0xb7   :  { %829 = vmatpush3.bf16.xpose.msk.msra.mxu0 %vm1061_vm13, %v731_v58  ;;  %v943_v60 = vpop.eup %942  ;;  %v252_v25 = vmul.f32 %v1075_v29, %v244_v38  ;;  %v928_v29 = vld [vmem:[#allocation2 + $0x38] sm:$0xff]  }
  0xb8   :  { %830 = vmatprep.subr.msk.bf16.mxu0 %vm1069_vm2, %v734_v59  ;;  %v945_v61 = vpop.eup %944  ;;  %v242_v8 = vmul.f32 %v943_v60, %v943_v60 }
  0xb9   :  { %v737_v62 = vpack.c.bf16 %v943_v60, %v945_v61  ;;  %v241_v7 = vmul.f32 %v945_v61, %v945_v61 }
  0xba   :  { %v250_v17 = vmul.f32 %v1083_v32, %v242_v8 }
  0xbb   :  { %v947_v63 = vpop.eup %946  ;;  %v249_v14 = vmul.f32 %v1081_v31, %v241_v7 }
  0xbc   :  { %v949_v0 = vpop.eup %948  ;;  %v240_v10 = vmul.f32 %v947_v63, %v947_v63 }
  0xbd   :  { %v740_v1 = vpack.c.bf16 %v947_v63, %v949_v0  ;;  %v239_v12 = vmul.f32 %v949_v0, %v949_v0 }
  0xbe   :  { %v248_v19 = vmul.f32 %v1093_v35, %v240_v10  ;;  %v243_v35 = vmul.f32 %v1103_v55, %v1103_v55 }
  0xbf   :  { %831 = vmatpush3.bf16.xpose.msk.msra.mxu0 %vm1069_vm2, %v734_v59  ;;  %v247_v21 = vmul.f32 %v1091_v34, %v239_v12 }
  0xc0   :  { %832 = vmatprep.subr.msk.bf16.mxu0 %vm1077_vm12, %v737_v62  ;;  %v251_v44 = vmul.f32 %v1073_v28, %v243_v35  ;;  %v925_v28 = vld [vmem:[#allocation2] sm:$0xff]  }
  0xc7   :  { %833 = vmatpush3.bf16.xpose.msk.msra.mxu0 %vm1077_vm12, %v737_v62 }
  0xc8   :  { %834 = vmatprep.subr.msk.bf16.mxu0 %vm1086_vm3, %v740_v1 }
  0xcf   :  { %835 = vmatpush3.bf16.xpose.msk.msra.mxu0 %vm1086_vm3, %v740_v1 }
  0xd0   :  { %872 = vmatprep.subr.bf16.mxu0 %v926_v52 }
  0xd6   :  { %837 = vmatmul.mubr.msk.bf16.vlgmr.msra.gmra.mxu0 %vm1049_vm8, %v998_v36 }
  0xd7   :  { %840 = vmatprep.mubr.msk.bf16.mxu0 %vm1045_vm5, %v998_v36  ;;  %873 = vmatpush3.bf16.msra.mxu0 %v926_v52  ;;  %vm402_vm5 = vcmask 261120   ;;  %v781_v52 = vld [vmem:[%s1196_s3 + $0x1] ss:$0 sm:$0xff] }
  0xd8   :  { %874 = vmatprep.subr.bf16.mxu0 %v927_v53 }
  0xdb   :  { %875 = vmatpush3.bf16.msra.mxu0 %v927_v53 }
  0xdc   :  { %876 = vmatprep.subr.bf16.mxu0 %v928_v29 }
  0xde   :  { %841 = vmatmul.mubr.msk.bf16.gmra.mxu0 %vm1041_vm4, %v998_v36  ;;  %v246_v36 = vmul.f32 %v1105_v56, %v1105_v56  ;;  %vm299_vm4 = vcmask 523264  }
  0xdf   :  { %877 = vmatpush3.bf16.msra.mxu0 %v928_v29 }
  0xe0   :  { %v254_v43 = vmul.f32 %v1067_v26, %v246_v36 }
 0x196   :  { %v838_v6 = vpop.f32.mrf.mxu0 }
 0x197   :  { %v233_v11 = vmul.f32 %v945_v61, %v838_v6  ;;  %v933_v6 = vld [vmem:[#allocation2 + $0x10] sm:$0xff]  }
 0x198   :  { %v174_v9 = vpop.f32.mrf.mxu0 }
 0x199   :  { %v231_v15 = vmul.f32 %v949_v0, %v174_v9  ;;  %v257_v20 = vadd.f32 %v249_v14, %v233_v11  ;;  %v766_v9 = vld [vmem:[%s1196_s3] ss:$0 sm:$0xff]  ;;  %s970_s3 = scalar_lea.vmem %s709_s10, 1024 }
 0x19a   :  { %v839_v13 = vpop.f32.mrf.mxu0  ;;  %p971_p5 = scmp.ne.s32.totalorder %s709_s10, %s970_s3  ;;  %p976_p7 = scmp.lt.s32.totalorder %s970_s3, %s970_s3 }
 0x19b   :  { %v234_v16 = vmul.f32 %v943_v60, %v839_v13  ;;  %v255_v30 = vadd.f32 %v247_v21, %v231_v15 }
 0x19c   :  { %v177_v18 = vpop.f32.mrf.mxu0  ;;  %p977_p8 = por %p976_p7, %p975_p6 }
 0x19d   :  { %v258_v22 = vadd.f32 %v250_v17, %v234_v16  ;;  %v232_v23 = vmul.f32 %v947_v63, %v177_v18 }
 0x19e   :  { %v842_v24 = vpop.f32.mrf.mxu0  ;;  %p978_p9 = pnand %p977_p8, %p971_p5 }
 0x19f   :  { %v1150_v33 = vpack.c.bf16 %v258_v22, %v257_v20  ;;  %v256_v31 = vadd.f32 %v248_v19, %v232_v23  ;;  %v237_v34 = vmul.f32 %v1101_v54, %v842_v24  ;;  %v929_v54 = vld [vmem:[#allocation2 + $0x30] sm:$0xff]  }
 0x1a0   :  { %v190_v32 = vpop.f32.mrf.mxu0  ;;  %878 = vmatprep.subr.bf16.mxu0 %v929_v54 }
 0x1a1   :  { %v263_v37 = vpack.c.bf16 %v256_v31, %v255_v30  ;;  %v235_v41 = vmul.f32 %v1103_v55, %v190_v32  ;;  %v261_v46 = vadd.f32 %v253_v40, %v237_v34  ;;  %v930_v55 = vld [vmem:[#allocation2 + $0x28] sm:$0xff]   ;;  %879 = vmatpush3.bf16.msra.mxu0 %v929_v54 }
 0x1a2   :  { %v843_v39 = vpop.f32.mrf.mxu0  ;;  %880 = vmatprep.subr.bf16.mxu0 %v930_v55 }
 0x1a3   :  { %v238_v42 = vmul.f32 %v1105_v56, %v843_v39  ;;  %852 = vmatprep.mubr.msk.bf16.mxu1 %vm299_vm4, %v263_v37  ;;  %v259_v49 = vadd.f32 %v251_v44, %v235_v41 }
 0x1a4   :  { %v193_v45 = vpop.f32.mrf.mxu0  ;;  %853 = vmatmul.mubr.msk.bf16.vlgmr.msra.gmra.mxu1 %vm299_vm4, %v1150_v33 }
 0x1a5   :  { %v262_v47 = vadd.f32 %v254_v43, %v238_v42  ;;  %v236_v48 = vmul.f32 %v1107_v57, %v193_v45  ;;  %861 = vmatpush3.bf16.msra.mxu1 %v924_v5  ;;  %881 = vmatpush3.bf16.msra.mxu0 %v930_v55  ;;  %v932_v5 = vld [vmem:[#allocation2 + $0x18] sm:$0xff]  }
 0x1a6   :  { %862 = vmatprep.subr.bf16.mxu1 %v925_v28  ;;  %882 = vmatprep.subr.bf16.mxu0 %v931_v4 }
 0x1a7   :  { %v1169_v50 = vpack.c.bf16 %v262_v47, %v261_v46  ;;  %v260_v51 = vadd.f32 %v252_v25, %v236_v48 }
 0x1a9   :  { %v1171_v26 = vpack.c.bf16 %v260_v51, %v259_v49  ;;  %863 = vmatpush3.bf16.msra.mxu1 %v925_v28  ;;  %883 = vmatpush3.bf16.msra.mxu0 %v931_v4 }
 0x1aa   :  { %884 = vmatprep.subr.bf16.mxu0 %v932_v5 }
 0x1ab   :  { %856 = vmatprep.mubr.msk.bf16.mxu1 %vm299_vm4, %v1171_v26 }
 0x1ac   :  { %857 = vmatmul.mubr.msk.bf16.gmra.mxu1 %vm299_vm4, %v1169_v50 }
 0x1ad   :  { %885 = vmatpush3.bf16.msra.mxu0 %v932_v5 }
 0x1ae   :  { %886 = vmatprep.subr.bf16.mxu0 %v933_v6 }
 0x1b1   :  { %887 = vmatpush3.bf16.msra.mxu0 %v933_v6 }
 0x264   :  { %v854_v56 = vpop.f32.mrf.mxu1 }
 0x266   :  { %v346_v57 = vpop.f32.mrf.mxu1 }
 0x268   :  { %v855_v58 = vpop.f32.mrf.mxu1 }
 0x269   :  { %v378_v61 = vpack.c.bf16 %v855_v58, %v854_v56 }
 0x26a   :  { %v349_v59 = vpop.f32.mrf.mxu1 }
 0x26b   :  { %v377_v60 = vpack.c.bf16 %v349_v59, %v346_v57 }
 0x26c   :  { %v858_v62 = vpop.f32.mrf.mxu1 }
 0x26d   :  { %864 = vmatprep.mubr.msk.bf16.mxu1 %vm402_vm5, %v377_v60 }
 0x26e   :  { %v362_v63 = vpop.f32.mrf.mxu1  ;;  %865 = vmatmul.mubr.msk.bf16.vlgmr.msra.gmra.mxu1 %vm402_vm5, %v378_v61 }
 0x270   :  { %v859_v0 = vpop.f32.mrf.mxu1 }
 0x271   :  { %v380_v3 = vpack.c.bf16 %v859_v0, %v858_v62 }
 0x272   :  { %v365_v1 = vpop.f32.mrf.mxu1 }
 0x273   :  { %v379_v2 = vpack.c.bf16 %v365_v1, %v362_v63 }
 0x275   :  { %868 = vmatprep.mubr.msk.bf16.mxu1 %vm402_vm5, %v379_v2 }
 0x276   :  { %869 = vmatmul.mubr.msk.bf16.gmra.mxu1 %vm402_vm5, %v380_v3 }
 0x277   :  { %904 = vmatprep.mubr.msk.bf16.mxu1 %vm299_vm4, %v263_v37 }
 0x32e   :  { %v866_v7 = vpop.f32.mrf.mxu1 }
 0x32f   :  { %v458_v13 = vadd.f32 %v866_v7, %v766_v9 }
 0x330   :  { %v449_v8 = vpop.f32.mrf.mxu1 }
 0x331   :  { %v450_v11 = vadd.f32 %v766_v9, %v449_v8  ;;  %v482_v20 = vmax.f32 %v458_v13, 0.0 }
 0x332   :  { %v867_v10 = vpop.f32.mrf.mxu1 }
 0x333   :  { %v461_v12 = vadd.f32 %v867_v10, %v766_v9  ;;  %v480_v18 = vmax.f32 %v450_v11, 0.0 }
 0x334   :  { %v452_v14 = vpop.f32.mrf.mxu1 }
 0x335   :  { %v453_v15 = vadd.f32 %v766_v9, %v452_v14  ;;  %v483_v16 = vmax.f32 %v461_v12, 0.0 }
 0x336   :  { %v870_v17 = vpop.f32.mrf.mxu1 }
 0x337   :  { %v481_v19 = vmax.f32 %v453_v15, 0.0  ;;  %v489_v23 = vpack.c.bf16 %v483_v16, %v482_v20  ;;  %v474_v31 = vadd.f32 %v870_v17, %v766_v9 }
 0x338   :  { %v465_v21 = vpop.f32.mrf.mxu1 }
 0x339   :  { %v488_v22 = vpack.c.bf16 %v481_v19, %v480_v18  ;;  %v466_v27 = vadd.f32 %v766_v9, %v465_v21  ;;  %v486_v38 = vmax.f32 %v474_v31, 0.0 }
 0x33a   :  { %v871_v24 = vpop.f32.mrf.mxu1 }
 0x33b   :  { %v477_v30 = vadd.f32 %v871_v24, %v766_v9  ;;  %888 = vmatprep.mubr.bf16.mxu0 %v488_v22  ;;  %v484_v34 = vmax.f32 %v466_v27, 0.0 }
 0x33c   :  { %v468_v36 = vpop.f32.mrf.mxu1  ;;  %889 = vmatmul.mubr.bf16.vlgmr.msra.gmra.mxu0 %v489_v23 }
 0x33d   :  { %v469_v32 = vadd.f32 %v766_v9, %v468_v36  ;;  %v487_v35 = vmax.f32 %v477_v30, 0.0 }
 0x33f   :  { %v485_v37 = vmax.f32 %v469_v32, 0.0  ;;  %v491_v40 = vpack.c.bf16 %v487_v35, %v486_v38 }
 0x341   :  { %v490_v39 = vpack.c.bf16 %v485_v37, %v484_v34 }
 0x343   :  { %892 = vmatprep.mubr.bf16.mxu0 %v490_v39 }
 0x344   :  { %893 = vmatmul.mubr.bf16.gmra.mxu0 %v491_v40 }
 0x3fc   :  { %v890_v41 = vpop.f32.mrf.mxu0 }
 0x3fe   :  { %v590_v42 = vpop.f32.mrf.mxu0 }
 0x400   :  { %v891_v43 = vpop.f32.mrf.mxu0 }
 0x401   :  { %v622_v51 = vpack.c.bf16 %v891_v43, %v890_v41 }
 0x402   :  { %v593_v44 = vpop.f32.mrf.mxu0 }
 0x403   :  { %v621_v28 = vpack.c.bf16 %v593_v44, %v590_v42 }
 0x404   :  { %v894_v45 = vpop.f32.mrf.mxu0 }
 0x406   :  { %v606_v46 = vpop.f32.mrf.mxu0 }
 0x408   :  { %v895_v47 = vpop.f32.mrf.mxu0 }
 0x409   :  { %v624_v48 = vpack.c.bf16 %v895_v47, %v894_v45 }
 0x40a   :  { %v609_v25 = vpop.f32.mrf.mxu0 }
 0x40b   :  { %v623_v49 = vpack.c.bf16 %v609_v25, %v606_v46  ;;  %896 = vmatprep.subr.bf16.mxu1 %v624_v48 }
 0x40c   :  { %897 = vmatpush3.bf16.msra.mxu1 %v624_v48 }
 0x40d   :  { %898 = vmatprep.subr.bf16.mxu1 %v623_v49 }
 0x410   :  { %899 = vmatpush3.bf16.msra.mxu1 %v623_v49 }
 0x411   :  { %900 = vmatprep.subr.bf16.mxu1 %v622_v51 }
 0x414   :  { %901 = vmatpush3.bf16.msra.mxu1 %v622_v51 }
 0x415   :  { %902 = vmatprep.subr.bf16.mxu1 %v621_v28 }
 0x418   :  { %903 = vmatpush3.bf16.msra.mxu1 %v621_v28 }
 0x41b   :  { %905 = vmatmul.mubr.msk.bf16.vlgmr.msra.gmra.mxu1 %vm299_vm4, %v1150_v33 }
 0x41c   :  { %908 = vmatprep.mubr.msk.bf16.mxu1 %vm299_vm4, %v1171_v26 }
 0x423   :  { %909 = vmatmul.mubr.msk.bf16.gmra.mxu1 %vm299_vm4, %v1169_v50 }
 0x4db   :  { %v906_v53 = vpop.f32.mrf.mxu1 }
 0x4dc   :  { %v673_v29 = vadd.f32 %v906_v53, %v781_v52 }
 0x4dd   :  { %v664_v54 = vpop.f32.mrf.mxu1 }
 0x4de   :  { %697 = vst [vmem:[#allocation5 + $0x10] sm:$0xff] %v673_v29  ;;  %v665_v55 = vadd.f32 %v781_v52, %v664_v54 }
 0x4df   :  { %v907_v56 = vpop.f32.mrf.mxu1 }
 0x4e0   :  { %695 = vst [vmem:[#allocation5] sm:$0xff] %v665_v55  ;;  %v676_v57 = vadd.f32 %v907_v56, %v781_v52 }
 0x4e1   :  { %v667_v58 = vpop.f32.mrf.mxu1 }
 0x4e2   :  { %698 = vst [vmem:[#allocation5 + $0x18] sm:$0xff] %v676_v57  ;;  %v668_v33 = vadd.f32 %v781_v52, %v667_v58 }
 0x4e3   :  { %v910_v59 = vpop.f32.mrf.mxu1 }
 0x4e4   :  { %696 = vst [vmem:[#allocation5 + $0x8] sm:$0xff] %v668_v33  ;;  %v689_v26 = vadd.f32 %v910_v59, %v781_v52 }
 0x4e5   :  { %v680_v60 = vpop.f32.mrf.mxu1 }
 0x4e6   :  { %701 = vst [vmem:[#allocation5 + $0x30] sm:$0xff] %v689_v26  ;;  %v681_v50 = vadd.f32 %v781_v52, %v680_v60 }
 0x4e7   :  { %v911_v61 = vpop.f32.mrf.mxu1 }
 0x4e8   :  { %699 = vst [vmem:[#allocation5 + $0x20] sm:$0xff] %v681_v50  ;;  %v692_v62 = vadd.f32 %v911_v61, %v781_v52 }
 0x4e9   :  { %v683_v63 = vpop.f32.mrf.mxu1 }
 0x4ea   :  { %702 = vst [vmem:[#allocation5 + $0x38] sm:$0xff] %v692_v62  ;;  %v684_v0 = vadd.f32 %v781_v52, %v683_v63 }
 0x4ec   :  { %700 = vst [vmem:[#allocation5 + $0x28] sm:$0xff] %v684_v0 }
 0x4ed   :  { %981 = shalt.err (!%p978_p9)
}
 0x4ee   :  { %s1000_s11 = smov 128   ;;  %s1001_s12 = smov 8  }
 0x4ef   :  { %714 = dma.vmem_to_hbm [thread:$0]  %s709_s10, 1024, %s1197_s4, [#allocation4], %s1000_s11, %s1000_s11, %s1001_s12  }
 0x4f0   :  { %992 = dma.done.wait [#allocation4], 1024  }
 0x4f1   :  { %993 = vsyncadd [#allocation4], 4294966272 }
 0x4f2   :  { %718 = vsyncpa [#allocation3], 1 }
 0x4f3   :  { %719 = vsyncpa [#allocation4], 1 }

</bundles_post_ra>
